<compile_context>
chip_gen: v7x
topology: tpu7x:2x2x1
jax: 0.10.0
libtpu: 0.0.40
codegen_flags: <defaults>
</compile_context>

<pallas_src>
import math
import functools

import jax
import jax.numpy as jnp
from jax.experimental import pallas as pl
from jax.experimental.pallas import tpu as pltpu

EPS = 1e-5                                   # LlamaRMSNorm eps
NEG = float(jnp.finfo(jnp.float32).min)      # masked_fill value (matches torch)
_MiB = 1024 * 1024


# ----------------------------- kernels --------------------------------------

def _query_kernel(que_ref, qmask_ref, ln_w_ref, out_ref):
    """Per-batch masked mean over query tokens -> RMSNorm (que_layernorm).
    No projection weights are loaded here (q_proj lives in the wrapper), so
    the VMEM footprint stays Q*H regardless of hidden size."""
    x = que_ref[...].astype(jnp.float32)                # (Q, H)
    m = qmask_ref[...]                                  # (Q, 1)
    xm = jnp.where(m > 0, x, 0.0)                       # masked_fill(~mask, 0)
    # max(count, 1) guards the all-masked degenerate row (reference would NaN).
    cnt = jnp.maximum(jnp.sum(m, axis=0, keepdims=True), 1.0)      # (1, 1)
    mean = jnp.sum(xm, axis=0, keepdims=True) / cnt                # (1, H)
    var = jnp.mean(mean * mean, axis=-1, keepdims=True)
    out_ref[...] = mean * jax.lax.rsqrt(var + EPS) * ln_w_ref[...]


def _pool_kernel(doc_ref, dmask_ref, wcomb_ref, ln_w_ref, expand_ref, out_ref,
                 *, window_size, head_dim, weights_dtype):
    """RMSNorm(doc) -> fused per-head scores -> window softmax -> weighted
    window sum.  One (batch, doc-tile) block per grid step; TD = PT * W rows."""
    W = window_size
    PT, H = out_ref.shape                        # windows in this tile, hidden
    NH = wcomb_ref.shape[-1]
    HD = head_dim

    # bf16 (or f32) HBM stream -> f32 math inside the kernel.
    x = doc_ref[...].astype(jnp.float32)         # (TD, H)
    m = dmask_ref[...]                           # (TD, 1)

    # doc_layernorm (RMSNorm), f32.
    var = jnp.mean(x * x, axis=-1, keepdims=True)
    xn = x * jax.lax.rsqrt(var + EPS) * ln_w_ref[...]              # (TD, H)

    # Fused k_proj + per-head score:  s[d, n] = <k_d, q_n> = xn @ (wk^T "@" q).
    # bf16 MXU inputs, f32 accumulation (wcomb arrives pre-cast to bf16).
    s = jnp.dot(xn.astype(jnp.bfloat16), wcomb_ref[...],
                preferred_element_type=jnp.float32)                # (TD, NH)
    s = s * (1.0 / math.sqrt(HD))
    s = jnp.where(m > 0, s, NEG)                 # mask fill (finfo.min)

    # Vectorized window softmax over groups of W consecutive rows (W % 8 == 0
    # keeps the (TD,*)->(PT,W,*) reshapes layout-preserving).
    s3 = s.reshape(PT, W, NH)
    mx = jnp.max(s3, axis=1, keepdims=True)                        # (PT, 1, NH)
    e3 = jnp.exp(s3 - mx)
    inv = 1.0 / jnp.sum(e3, axis=1, keepdims=True)   # PT*NH divides, not TD*NH
    pv3 = e3 * inv                                                 # (PT, W, NH)

    if HD % 128 == 0:
        # Lane-aligned per-head slices: no (TD, H) w_full temp at all.
        xn3 = xn.reshape(PT, W, H)
        for n in range(NH):
            sl = slice(n * HD, (n + 1) * HD)
            out_ref[:, sl] = (xn3[:, :, sl] * pv3[:, :, n:n + 1]
                              ).sum(axis=1).astype(out_ref.dtype)
    else:
        # Small-HD path: 0/1 head->channel expansion matmul (MXU is idle after
        # the k_proj fusion).  Done in bf16 when the doc stream is bf16 to
        # halve the temp and the extra vld/vst pass.
        pv = pv3.reshape(PT * W, NH).astype(weights_dtype)
        w_full = jnp.dot(pv, expand_ref[...],
                         preferred_element_type=weights_dtype)     # (TD, H)
        out_ref[...] = (xn * w_full).reshape(PT, W, H).sum(axis=1).astype(out_ref.dtype)


# ----------------------------- tiling helpers --------------------------------

def _tpu_vmem_capacity():
    try:
        info = pltpu.get_tpu_info()
        cap = int(getattr(info, "vmem_capacity_bytes", 0) or 0)
        return cap if cap > 0 else None
    except Exception:
        return None


def _choose_doc_tiling(P, W, H, NH, in_bytes):
    """Pick windows-per-tile PT (multiple of 8 unless it covers the whole
    axis), the number of extra zero windows needed so PT | P, and a
    generation-aware vmem limit."""
    cap = _tpu_vmem_capacity()
    if cap is None:                              # unknown hw: stay conservative
        budget, vmem_limit = 24 * _MiB, None
    elif cap <= 64 * _MiB:                       # v7x-class: VMEM is scarce
        budget, vmem_limit = 28 * _MiB, 40 * _MiB
    else:                                        # v5e / v6e: 128 MiB physical
        budget, vmem_limit = 72 * _MiB, 96 * _MiB
    # Rough live bytes per doc row per grid step: double-buffered input stream
    # + f32 xn + softmax / product temps.
    bytes_per_row = H * (2 * in_bytes + 3 * 4) + NH * 24
    target_rows = max(W, min(2048, budget // max(1, bytes_per_row)))
    target_pt = max(1, target_rows // W)
    if target_pt >= P:
        return P, 0, vmem_limit                  # single tile along doc axis
    pt = max(8, (target_pt // 8) * 8)
    if pt >= P:
        return P, 0, vmem_limit
    extra = (-P) % pt                            # whole zero windows to append
    return pt, extra, vmem_limit


# ----------------------------- wrapper ---------------------------------------

def pooling_layer_forward(que_hidden, doc_hidden, enc_doc_mask, enc_que_mask,
                          params, window_size):
    B, Q, H = que_hidden.shape
    _, d_len, _ = doc_hidden.shape
    NH = params["num_heads"]
    HD = H // NH
    W = window_size
    assert W % 8 == 0, "window_size must be a multiple of 8 (sublane tile)"
    # TODO(synk): pad/mask inside the window for window sizes not a multiple of 8.

    # Prepend-zero padding so d_len % window_size == 0 (reference semantics).
    if d_len % W != 0:
        pad = W - d_len % W
        doc_hidden = jnp.concatenate(
            [jnp.zeros((B, pad, H), doc_hidden.dtype), doc_hidden], axis=1)
        enc_doc_mask = jnp.concatenate(
            [jnp.zeros((B, pad), enc_doc_mask.dtype), enc_doc_mask], axis=1)
        d_len = d_len + pad
    P = d_len // W

    que_mask3 = enc_que_mask[..., None].astype(jnp.float32)      # (B, Q, 1)
    doc_mask3 = enc_doc_mask[..., None].astype(jnp.float32)      # (B, D, 1)

    wq_t = params["wq"].T.astype(jnp.float32)    # (H, H): y = x @ W.T (nn.Linear)
    wk_t = params["wk"].T.astype(jnp.float32)
    ln_q = params["que_ln"].reshape(1, H).astype(jnp.float32)
    ln_d = params["doc_ln"].reshape(1, H).astype(jnp.float32)

    # ---- query path: Pallas masked mean + RMSNorm; q_proj stays in XLA ------
    qn = pl.pallas_call(
        _query_kernel,
        out_shape=jax.ShapeDtypeStruct((B, 1, H), jnp.float32),
        grid=(B,),
        in_specs=[
            pl.BlockSpec((None, Q, H), lambda b: (b, 0, 0)),
            pl.BlockSpec((None, Q, 1), lambda b: (b, 0, 0)),
            pl.BlockSpec((1, H), lambda b: (0, 0)),
        ],
        out_specs=pl.BlockSpec((None, 1, H), lambda b: (b, 0, 0)),
        compiler_params=pltpu.CompilerParams(dimension_semantics=("parallel",)),
    )(que_hidden, que_mask3, ln_q).reshape(B, H)

    # q_proj + algebraic k_proj fusion (tiny GEMMs; keeps the (H,H) weights
    # out of kernel VMEM, which matters on v7x at large H):
    #   s[b, d, n] = doc_n[b, d] @ W_comb[b, :, n],  W_comb = wk^T "@" q
    query = qn @ wq_t                                             # (B, H)
    wcomb = jnp.einsum("hnf,bnf->bhn",
                       wk_t.reshape(H, NH, HD),
                       query.reshape(B, NH, HD))                  # (B, H, NH)
    wcomb = wcomb.astype(jnp.bfloat16)   # bf16 MXU inputs, f32 accumulation

    in_bytes = jnp.dtype(doc_hidden.dtype).itemsize
    # bf16 softmax weights only when the doc stream itself is low precision.
    weights_dtype = jnp.bfloat16 if in_bytes < 4 else jnp.float32
    # 0/1 head -> channel expansion matrix (NH, H) (used only when HD < 128).
    expand = (jnp.arange(H)[None, :] // HD ==
              jnp.arange(NH)[:, None]).astype(weights_dtype)

    # ---- doc tiling: generation-aware size + divisibility padding -----------
    PT, extra, vmem_limit = _choose_doc_tiling(P, W, H, NH, in_bytes)
    if extra:
        # Append whole zero windows so PT | P_pad; sliced off after the call.
        doc_hidden = jnp.concatenate(
            [doc_hidden, jnp.zeros((B, extra * W, H), doc_hidden.dtype)], axis=1)
        doc_mask3 = jnp.concatenate(
            [doc_mask3, jnp.zeros((B, extra * W, 1), doc_mask3.dtype)], axis=1)
    P_pad = P + extra
    TD = PT * W
    n_d_tiles = P_pad // PT

    cp_kwargs = dict(dimension_semantics=("parallel", "parallel"))
    if vmem_limit is not None:
        cp_kwargs["vmem_limit_bytes"] = vmem_limit

    kern = functools.partial(_pool_kernel, window_size=W, head_dim=HD,
                             weights_dtype=weights_dtype)
    pooled_h = pl.pallas_call(
        kern,
        out_shape=jax.ShapeDtypeStruct((B, P_pad, H), jnp.float32),
        grid=(B, n_d_tiles),
        in_specs=[
            # Doc tile streamed in its HBM dtype (bf16 recommended).
            # TODO(synk): pipeline_mode=pl.Buffered(3) here if profiling shows
            # exposed DMA on v5e (not on v7x where VMEM is the scarce resource).
            pl.BlockSpec((None, TD, H), lambda b, d: (b, d, 0)),
            pl.BlockSpec((None, TD, 1), lambda b, d: (b, d, 0)),   # doc mask
            pl.BlockSpec((None, H, NH), lambda b, d: (b, 0, 0)),   # fused W_comb
            pl.BlockSpec((1, H), lambda b, d: (0, 0)),             # doc RMSNorm w
            pl.BlockSpec((NH, H), lambda b, d: (0, 0)),            # head expand
        ],
        out_specs=pl.BlockSpec((None, PT, H), lambda b, d: (b, d, 0)),
        compiler_params=pltpu.CompilerParams(**cp_kwargs),
    )(doc_hidden, doc_mask3, wcomb, ln_d, expand)

    if extra:
        pooled_h = pooled_h[:, :P, :]

    # Pooled attention mask: trivially cheap in plain JAX.
    pooled_m = (enc_doc_mask.reshape(B, P, W).astype(jnp.float32).sum(-1) > 0
                ).astype(enc_doc_mask.dtype)
    return pooled_h, pooled_m


# ----------------------------- pure-JAX reference ----------------------------

def reference_forward(que, doc, dmask, qmask, params, window_size):
    B, _, H = que.shape
    NH = params["num_heads"]
    HD = H // NH
    d_len = doc.shape[1]
    if d_len % window_size != 0:
        pad = window_size - d_len % window_size
        doc = jnp.concatenate([jnp.zeros((B, pad, H), doc.dtype), doc], axis=1)
        dmask = jnp.concatenate([jnp.zeros((B, pad), dmask.dtype), dmask], axis=1)
        d_len += pad
    P = d_len // window_size

    def rms(x, w):
        v = jnp.mean(x.astype(jnp.float32) ** 2, axis=-1, keepdims=True)
        return (x * jax.lax.rsqrt(v + EPS)) * w

    docn = rms(doc, params["doc_ln"])
    qm = jnp.where(qmask[..., None] > 0, que, 0.0)
    qmean = qm.sum(axis=1) / qmask[..., None].sum(axis=1)
    qmean = rms(qmean, params["que_ln"])
    q = (qmean @ params["wq"].T).reshape(B, NH, HD)
    k = (docn @ params["wk"].T).reshape(B, d_len, NH, HD).transpose(0, 2, 1, 3)
    v = docn.reshape(B, d_len, NH, HD).transpose(0, 2, 1, 3)
    pw = jnp.einsum("bnh,bndh->bnd", q, k) / math.sqrt(HD)
    pw = jnp.where(dmask[:, None, :] > 0, pw, jnp.finfo(jnp.float32).min)
    pw = jax.nn.softmax(pw.reshape(B, NH, P, window_size).astype(jnp.float32), axis=-1)
    cw = jnp.transpose(pw, (0, 2, 3, 1))                          # (B,P,W,NH)
    cw = jnp.repeat(cw[..., None], HD, axis=-1).reshape(B, P, window_size, H)
    cv = jnp.transpose(v, (0, 2, 1, 3)).reshape(B, P, window_size, H)
    ph = (cv * cw).sum(axis=2)
    pm = (dmask.reshape(B, P, window_size).sum(axis=-1) > 0).astype(dmask.dtype)
    return ph, pm


# ----------------------------- main -------------------------------------------

if __name__ == "__main__":
    B, Q, H, NH, W = 2, 8, 32, 4, 16
    D = 40  # not a multiple of W -> exercises the prepend-zero padding path

    key = jax.random.PRNGKey(0)
    k1, k2, k3, k4, k5, k6 = jax.random.split(key, 6)
    que = jax.random.normal(k1, (B, Q, H), jnp.float32)
    # Production doc hidden states are bf16: the kernel streams them as-is
    # (halving the dominant HBM read) and upcasts to f32 in-kernel.
    doc = jax.random.normal(k2, (B, D, H), jnp.float32).astype(jnp.bfloat16)
    qmask = (jax.random.uniform(k3, (B, Q)) > 0.3).astype(jnp.float32)
    qmask = qmask.at[:, 0].set(1.0)  # guarantee at least one valid query token
    dmask = (jax.random.uniform(k4, (B, D)) > 0.3).astype(jnp.float32)

    # Deterministic synthetic parameters (shapes from PoolingLayer.__init__).
    params = {
        "num_heads": NH,
        "wq": jax.random.normal(k5, (H, H), jnp.float32) * 0.05,   # q_proj.weight (out,in)
        "wk": jax.random.normal(k6, (H, H), jnp.float32) * 0.05,   # k_proj.weight (out,in)
        "doc_ln": jnp.ones((H,), jnp.float32),                      # LlamaRMSNorm weight
        "que_ln": jnp.ones((H,), jnp.float32),
    }

    # TODO(synk): random window-size selection (random.choice over cand sizes)
    # is training-time stochasticity; here window_size is a static argument.
    ph, pm = pooling_layer_forward(que, doc, dmask, qmask, params, window_size=W)
    jax.block_until_ready((ph, pm))

    rh, rm = reference_forward(que, doc, dmask, qmask, params, W)
    assert ph.shape == rh.shape and pm.shape == rm.shape
    # bf16 doc stream + bf16 MXU inputs -> bf16-appropriate tolerance.
    assert jnp.allclose(ph, rh, atol=1e-2, rtol=1e-2), "pooled hidden mismatch"
    assert jnp.array_equal(pm, rm), "pooled mask mismatch"

    print("KERNEL_OK")
</pallas_src>

<mosaic_0001>
module attributes {stable_mosaic.version = 11 : i64} {
  func.func @_query_kernel(%arg0: i32, %arg1: memref<1x8x32xf32, #tpu.memory_space<vmem>>, %arg2: memref<1x8x1xf32, #tpu.memory_space<vmem>>, %arg3: memref<1x32xf32, #tpu.memory_space<vmem>>, %arg4: memref<1x1x32xf32, #tpu.memory_space<vmem>>) attributes {dimension_semantics = [#tpu.dimension_semantics<parallel>], iteration_bounds = array<i64: 2>, scalar_prefetch = 0 : i64, scratch_operands = 0 : i64, tpu.core_type = #tpu.core_type<tc>, window_params = [{transform_indices = @transform_0, window_bounds = array<i64: 1, 8, 32>}, {transform_indices = @transform_1, window_bounds = array<i64: 1, 8, 1>}, {pipeline_mode = #tpu.pipeline_mode<synchronous>, transform_indices = @transform_2, window_bounds = array<i64: 1, 32>}, {transform_indices = @transform_3, window_bounds = array<i64: 1, 1, 32>}]} {
    %c0 = arith.constant 0 : index
    %c0_0 = arith.constant 0 : index
    %c0_1 = arith.constant 0 : index
    %0 = vector.load %arg1[%c0, %c0_0, %c0_1] : memref<1x8x32xf32, #tpu.memory_space<vmem>>, vector<1x8x32xf32>
    %1 = vector.shape_cast %0 : vector<1x8x32xf32> to vector<8x32xf32>
    %c0_2 = arith.constant 0 : index
    %c0_3 = arith.constant 0 : index
    %c0_4 = arith.constant 0 : index
    %2 = vector.load %arg2[%c0_2, %c0_3, %c0_4] : memref<1x8x1xf32, #tpu.memory_space<vmem>>, vector<1x8x1xf32>
    %3 = vector.shape_cast %2 : vector<1x8x1xf32> to vector<8x1xf32>
    %cst = arith.constant 0.000000e+00 : f32
    %4 = vector.broadcast %cst : f32 to vector<8x1xf32>
    %5 = arith.cmpf ogt, %3, %4 : vector<8x1xf32>
    %cst_5 = arith.constant 0.000000e+00 : f32
    %6 = vector.shape_cast %5 : vector<8x1xi1> to vector<8x1xi1>
    %7 = vector.broadcast %6 : vector<8x1xi1> to vector<8x32xi1>
    %8 = vector.broadcast %cst_5 : f32 to vector<8x32xf32>
    %9 = arith.select %7, %1, %8 : vector<8x32xi1>, vector<8x32xf32>
    %cst_6 = arith.constant dense<0.000000e+00> : vector<1xf32>
    %10 = vector.multi_reduction <add>, %3, %cst_6 [0] : vector<8x1xf32> to vector<1xf32>
    %11 = vector.shape_cast %10 : vector<1xf32> to vector<1x1xf32>
    %cst_7 = arith.constant 1.000000e+00 : f32
    %12 = vector.broadcast %cst_7 : f32 to vector<1x1xf32>
    %13 = arith.maximumf %11, %12 : vector<1x1xf32>
    %cst_8 = arith.constant dense<0.000000e+00> : vector<32xf32>
    %14 = vector.multi_reduction <add>, %9, %cst_8 [0] : vector<8x32xf32> to vector<32xf32>
    %15 = vector.shape_cast %14 : vector<32xf32> to vector<1x32xf32>
    %16 = vector.broadcast %13 : vector<1x1xf32> to vector<1x32xf32>
    %17 = arith.divf %15, %16 : vector<1x32xf32>
    %18 = arith.mulf %17, %17 : vector<1x32xf32>
    %cst_9 = arith.constant dense<0.000000e+00> : vector<1xf32>
    %19 = vector.multi_reduction <add>, %18, %cst_9 [1] : vector<1x32xf32> to vector<1xf32>
    %20 = vector.shape_cast %19 : vector<1xf32> to vector<1x1xf32>
    %cst_10 = arith.constant 3.200000e+01 : f32
    %21 = vector.broadcast %cst_10 : f32 to vector<1x1xf32>
    %22 = arith.divf %20, %21 : vector<1x1xf32>
    %cst_11 = arith.constant 9.99999974E-6 : f32
    %23 = vector.broadcast %cst_11 : f32 to vector<1x1xf32>
    %24 = arith.addf %22, %23 : vector<1x1xf32>
    %25 = math.rsqrt %24 : vector<1x1xf32>
    %26 = vector.broadcast %25 : vector<1x1xf32> to vector<1x32xf32>
    %27 = arith.mulf %17, %26 : vector<1x32xf32>
    %c0_12 = arith.constant 0 : index
    %c0_13 = arith.constant 0 : index
    %28 = vector.load %arg3[%c0_12, %c0_13] : memref<1x32xf32, #tpu.memory_space<vmem>>, vector<1x32xf32>
    %29 = arith.mulf %27, %28 : vector<1x32xf32>
    %c0_14 = arith.constant 0 : index
    %c0_15 = arith.constant 0 : index
    %c0_16 = arith.constant 0 : index
    %30 = vector.load %arg4[%c0_14, %c0_15, %c0_16] : memref<1x1x32xf32, #tpu.memory_space<vmem>>, vector<1x1x32xf32>
    %31 = vector.shape_cast %30 : vector<1x1x32xf32> to vector<1x32xf32>
    %32 = vector.shape_cast %29 : vector<1x32xf32> to vector<1x1x32xf32>
    tpu.vector_store %arg4[%c0_14, %c0_15, %c0_16], %32 {strides = array<i32>} : memref<1x1x32xf32, #tpu.memory_space<vmem>>, vector<1x1x32xf32>,
    return
  }
  func.func @transform_0(%arg0: i32) -> (i32, i32, i32) {
    %c0_i32 = arith.constant 0 : i32
    %c0_i32_0 = arith.constant 0 : i32
    %c0_i32_1 = arith.constant 0 : i32
    return %arg0, %c0_i32, %c0_i32_0 : i32, i32, i32
  }
  func.func @transform_1(%arg0: i32) -> (i32, i32, i32) {
    %c0_i32 = arith.constant 0 : i32
    %c0_i32_0 = arith.constant 0 : i32
    %c0_i32_1 = arith.constant 0 : i32
    return %arg0, %c0_i32, %c0_i32_0 : i32, i32, i32
  }
  func.func @transform_2(%arg0: i32) -> (i32, i32) {
    %c0_i32 = arith.constant 0 : i32
    %c0_i32_0 = arith.constant 0 : i32
    %c0_i32_1 = arith.constant 0 : i32
    return %c0_i32, %c0_i32_0 : i32, i32
  }
  func.func @transform_3(%arg0: i32) -> (i32, i32, i32) {
    %c0_i32 = arith.constant 0 : i32
    %c0_i32_0 = arith.constant 0 : i32
    %c0_i32_1 = arith.constant 0 : i32
    return %arg0, %c0_i32, %c0_i32_0 : i32, i32, i32
  }
}

</mosaic_0001>

<bundles_post_ra>
// kernel: tpu_custom_call.1
= control target key start
LH: loop header
LB: loop body
LE: loop exit
PB: predicated region body
PF: predicated region fallthrough
CT: control target
= control target key end

     0   :  { %8 = vsyncpa [#allocation3], 0  ;;  %s554_s0 = inlined_call_operand.vmem [shape: f32[2,8,32], index: 0, kind: input, shape index: {}]   ;;  %s555_s1 = inlined_call_operand.vmem [shape: f32[2,8,1], index: 1, kind: input, shape index: {}]   ;;  %s556_s2 = inlined_call_operand.vmem [shape: f32[1,32], index: 2, kind: input, shape index: {}]   ;;  %s557_s3 = inlined_call_operand.hbm [shape: f32[2,1,32], index: 3, kind: output, shape index: {}]  }
   0x1   :  { %10 = vsyncpa [#allocation3 + $0x1], 0  ;;  %s448_s12 = smov 0   ;;  %s450_s13 = smov 0  }
   0x2   :  { %s452_s14 = smov 0   ;;  %s454_s15 = smov 0  }
   0x3 LB: > { %s469_s16 = sadd.s32 4294967295, %s424_s15   ;;  %s308_s17 = sadd.s32 4294967294, %s424_s15   ;;  %s424_s15 = sphi %s454_s15, %s563_s15   ;;  %s420_s14 = sphi %s452_s14, %s562_s14   ;;  %s416_s13 = sphi %s450_s13, %s561_s13   ;;  %s412_s12 = sphi %s448_s12, %s560_s12  }
   0x4   : > { %s473_s18 = sadd.s32 1, %s424_s15   ;;  %s96_s19 = sadd.s32 1, %s420_s14 }
   0x5   : > { %s93_s20 = ssub.s32 %s424_s15, %s473_s18  ;;  %p106_p0 = scmp.ne.s32.totalorder %s420_s14, %s416_s13 }
   0x6   : > { %p94_p1 = scmp.eq.s32.totalorder %s93_s20, 0  ;;  %p107_p2 = scmp.eq.s32.totalorder %s469_s16, 1 }
   0x7   : > { %p112_p3 = scmp.ne.s32.totalorder %s416_s13, %s412_s12  ;;  %p113_p4 = scmp.eq.s32.totalorder %s308_s17, 1 }
   0x8   : > { %s484_s21 = scalar_select %p94_p1, %s420_s14, %s96_s19  }
   0x9   : > { %p486_p5 = por %p107_p2, %p106_p0  ;;  %p490_p6 = por %p113_p4, %p112_p3 }
   0xa   : > { %p311_p7 = scmp.ge.s32.totalorder %s424_s15, 1  ;;  %p148_p8 = scmp.lt.s32.totalorder %s424_s15, 3 }
   0xc   : > { %p149_p9 = pnand %p311_p7, %p148_p8 }
   0xd   : > { %p174_p10 = scmp.lt.s32.totalorder (!%p149_p9), %s469_s16, 1  ;;  %v426_v0 = vmov (!%p149_p9), 0   ;;  %vm191_vm0 = vcmask (!%p149_p9), 7168   ;;  %vm200_vm2 = vcmask (!%p149_p9), 261120   ;;  %s172_s5 = sand.u32 (!%p149_p9), 1, %s416_s13   ;;  %vm226_vm4 = vcmask (!%p149_p9), 253952  }
   0xe   : > { %152 = sbr.rel (%p149_p9) target bundleno = 360 (0x168), region = 32  ;;  %357 = vset.pattern.permute.xlu0 (!%p149_p9), %v426_v0  ;;  %v224_v30 = vld [vmem:[%s556_s2] sm:$0x1] (!%p149_p9)  ;;  %s314_s8 = sshll.u32 (!%p149_p9), %s469_s16, 4 }
   0xf   : > { %s173_s9 = scalar_lea.vmem (!%p149_p9), [#allocation2], %s172_s5  ;;  %s512_s19 = scalar_lea.hbm (!%p149_p9), %s557_s3, %s314_s8 }
  0x10   : > { %s241_s10 = sshll.u32 (!%p149_p9), %s173_s9, 4  ;;  %s229_s20 = scalar_lea.sflag (!%p149_p9), [#allocation3], %s172_s5  ;;  %s514_s10 = int_to_ptr.vmem [resolvable:$true] %s241_s10 }
  0x15   : > { %s175_s24 = scalar_select %p174_p10, %s469_s16, 1 }
  0x16   : > { %s427_s16 = smov [#allocation2]  }
  0x17   : > { %s312_s25 = sshll.u32 %s175_s24, 3  ;;  %s362_s24 = scalar_lea.vmem %s514_s10, 16 }
  0x18   : > { %s181_s28 = scalar_lea.vmem %s555_s1, %s312_s25  ;;  %s177_s4 = scalar_lea.vmem %s554_s0, %s312_s25 }
  0x19   : > { %v183_v1 = vld [vmem:[%s181_s28] sm:$0xff]  ;;  %p363_p11 = scmp.ne.s32.totalorder %s514_s10, %s362_s24  ;;  %s366_s25 = sshll.u32 %s427_s16, 4  ;;  %s367_s25 = int_to_ptr.vmem [resolvable:$false] %s366_s25 }
  0x1a   : > { %vm184_vm1 = vcmp.gt.f32.partialorder %v183_v1, 0.0  ;;  %v192_v2 = vsel %vm191_vm0, %v183_v1, 0.0  ;;  %v182_v11 = vld [vmem:[%s177_s4] sm:$0xff]  ;;  %s368_s26 = scalar_lea.vmem %s367_s25, 32  ;;  %p369_p0 = scmp.lt.s32.totalorder %s514_s10, %s367_s25 }
  0x1b   : > { %v185_v3 = vsel %vm184_vm1, 1, %v426_v0  ;;  %v193_v4 = vrot.slane %v192_v2, 4  ;;  %p364_p12 = pnand %p363_p11, %p486_p5  ;;  %p370_p1 = scmp.lt.s32.totalorder %s368_s26, %s362_s24 }
  0x1c   : > { %187 = vperm.xlu0 %357, %v185_v3  }
  0x1d   : > { %v194_v5 = vadd.f32 %v193_v4, %v192_v2  ;;  %p365_p13 = pneg %p364_p12  ;;  %p371_p2 = por %p370_p1, %p369_p0 }
  0x1f   : > { %v195_v6 = vrot.slane %v194_v5, 2  ;;  %p372_p3 = pnand %p371_p2, %p365_p13 }
  0x21   : > { %v196_v7 = vadd.f32 %v195_v6, %v194_v5 }
  0x23   : > { %v197_v8 = vrot.slane %v196_v7, 1 }
  0x25   : > { %v198_v9 = vadd.f32 %v197_v8, %v196_v7 }
  0x27   : > { %v199_v10 = vmax.f32 %v198_v9, 1.0 }
  0x29   : > { %210 = vperm.xlu0 %357, %v199_v10  }
  0x9b   : > { %v188_v12 = vpop.permute.xlu0 %187 }
  0x9c   : > { %vm189_vm3 = vcmp.eq.s32.totalorder %v188_v12, 1 }
  0x9d   : > { %v190_v13 = vsel %vm189_vm3, %v182_v11, 0.0 }
  0x9e   : > { %v201_v14 = vsel %vm200_vm2, %v190_v13, 0.0 }
  0x9f   : > { %v202_v15 = vrot.slane %v201_v14, 4 }
  0xa1   : > { %v203_v16 = vadd.f32 %v202_v15, %v201_v14 }
  0xa3   : > { %v204_v17 = vrot.slane %v203_v16, 2 }
  0xa5   : > { %v205_v19 = vadd.f32 %v204_v17, %v203_v16 }
  0xa7   : > { %v206_v20 = vrot.slane %v205_v19, 1 }
  0xa8   : > { %v211_v18 = vpop.permute.xlu0 %210 }
  0xa9   : > { %358 = vrcp.f32 %v211_v18  ;;  %v207_v21 = vadd.f32 %v206_v20, %v205_v19 }
  0xb3   : > { %v359_v22 = vpop.eup %358 }
  0xb4   : > { %v214_v23 = vmul.f32 %v359_v22, %v207_v21 }
  0xb6   : > { %v215_v24 = vmul.f32 %v214_v23, %v214_v23 }
  0xb8   : > { %v216_v25 = vsel %vm200_vm2, %v215_v24, 0.0 }
  0xb9   : > { %217 = vadd.xlane.f32.xlu1 %v216_v25 }
 0x146   : > { %v218_v26 = vpop.xlane.xlu1 %217 }
 0x147   : > { %v220_v27 = vmul.f32 0.03125, %v218_v26 }
 0x149   : > { %v221_v28 = vadd.f32 1e-05, %v220_v27 }
 0x14b   : > { %360 = vrsqrt.f32 %v221_v28 }
 0x155   : > { %v361_v29 = vpop.eup %360 }
 0x156   : > { %v223_v31 = vmul.f32 %v361_v29, %v214_v23 }
 0x158   : > { %v225_v32 = vmul.f32 %v224_v30, %v223_v31 }
 0x15a   : > { %227 = vst.msk [vmem:[%s173_s9] sm:$0x1] %vm226_vm4, %v225_v32 }
 0x15b   : > { %375 = shalt.err (!%p372_p3)
}
 0x15c   : > { %s376_s27 = scalar_lea.hbm %s512_s19, 16  ;;  %s380_s30 = scalar_lea.hbm %s557_s3, 32 }
 0x15d   : > { %p377_p4 = scmp.ne.s32.totalorder %s512_s19, %s376_s27  ;;  %p381_p9 = scmp.lt.u32.totalorder %s512_s19, %s557_s3 }
 0x15e   : > { %p382_p10 = scmp.lt.u32.totalorder %s380_s30, %s376_s27  ;;  %p384_p12 = scmp.lt.u32.totalorder %s376_s27, %s512_s19 }
 0x15f   : > { %p378_p7 = pnand %p377_p4, %p486_p5 }
 0x160   : > { %p383_p11 = por %p382_p10, %p381_p9 }
 0x161   : > { %p379_p8 = pneg %p378_p7 }
 0x162   : > { %p385_p13 = por %p384_p12, %p383_p11 }
 0x164   : > { %p386_p0 = pnand %p385_p13, %p379_p8 }
 0x166   : > { %389 = shalt.err (!%p386_p0)
}
 0x167   : > { %317 = dma.vmem_to_hbm [thread:$0]  (%p486_p5), %s514_s10, 16, %s512_s19, %s229_s20  }
 0x168 PF: > { %p323_p1 = scmp.ge.s32.totalorder %s424_s15, 2  ;;  %s253_s6 = sand.u32 1, %s412_s12  }
 0x169   : > { %s254_s7 = scalar_lea.sflag [#allocation3], %s253_s6 }
 0x16a   : > { %p320_p2 = pnand %p323_p1, %p490_p6 }
 0x16c   : > { %407 = dma.done.wait (!%p320_p2), %s254_s7, 16  }
 0x16d   : > { %409 = vsyncadd (!%p320_p2), %s254_s7, 4294967280  ;;  %p13_p3 = scmp.ge.s32.totalorder %s473_s18, 4   ;;  %s560_s12 = smov %s416_s13 }
 0x16e   : > { %s561_s13 = smov %s420_s14  ;;  %s562_s14 = smov %s484_s21 }
 0x16f   : > { %s563_s15 = smov %s473_s18  ;;  %15 = sbr.rel (!%p13_p3) target bundleno = 3 (0x3), region = 70 }
 0x176   :  { %258 = vsyncpa [#allocation3], 1 }
 0x177   :  { %260 = vsyncpa [#allocation3 + $0x1], 1 }

</bundles_post_ra>
